<compile_context>
chip_gen: v5e
topology: v5e:2x2
jax: 0.10.0
libtpu: 0.0.40
codegen_flags: <defaults>
</compile_context>

<pallas_src>
import jax
import jax.numpy as jnp
from jax.experimental import pallas as pl
from jax.experimental.pallas import tpu as pltpu

BN_EPS = 1e-5
NEG_SLOPE = 0.2
LANE = 128


def _round_up(x, m):
    return ((x + m - 1) // m) * m


def _vmem_capacity_bytes():
    try:
        info = pltpu.get_tpu_info()
        cap = getattr(info, "vmem_capacity_bytes", None)
        if cap:
            return int(cap)
    except Exception:
        pass
    return 64 * 1024 * 1024  # conservative: v7x per-TC VMEM


def conv_stats_kernel(patches_ref, w_ref, conv_ref, sum_ref, sumsq_ref):
    """Per M-tile (channel-major): conv_t = W @ patches on the MXU (bf16 in,
    f32 acc), stored bf16. Per-channel sum / sum-of-squares for this tile are
    written to per-tile partial outputs (keeps the M axis fully parallel)."""
    conv = jnp.dot(w_ref[...], patches_ref[...],
                   preferred_element_type=jnp.float32)          # (C_sub, TM) f32
    conv_ref[...] = conv.astype(conv_ref.dtype)                 # bf16 intermediate
    sum_ref[...] = jnp.sum(conv, axis=1, keepdims=True)[None]           # (1,C_sub,1)
    sumsq_ref[...] = jnp.sum(conv * conv, axis=1, keepdims=True)[None]  # (1,C_sub,1)


def bn_lrelu_kernel(conv_ref, scale_ref, shift_ref, out_ref):
    """Per M-tile: y = conv * scale + shift (folded BN), then LeakyReLU(0.2)."""
    y = conv_ref[...].astype(jnp.float32) * scale_ref[...] + shift_ref[...]
    out_ref[...] = jnp.where(y > 0, y, NEG_SLOPE * y)


def cnn_block_forward(x_nchw, weight_oihw, gamma, beta, *, stride=2):
    """x_nchw: (N, Cin, H, W); weight_oihw: (Cout, Cin, 4, 4).
    Returns NCHW output matching PyTorch CNNBlock.forward (training-mode BN)."""
    N, Cin, H, W = x_nchw.shape
    Cout, _, KH, KW = weight_oihw.shape
    assert (KH, KW) == (4, 4)
    pad = 1
    OH = (H + 2 * pad - KH) // stride + 1
    OW = (W + 2 * pad - KW) // stride + 1
    M = N * OH * OW
    K = KH * KW * Cin                       # multiple of 16 -> no contraction padding
    C_sub = _round_up(Cout, 16)             # sublane-dim channel pad (bf16 packing)

    # ---- layout glue (XLA): reflect pad + im2col in channel-major (K, M) -------
    x = x_nchw.astype(jnp.float32)
    x_pad = jnp.pad(x, ((0, 0), (0, 0), (pad, pad), (pad, pad)), mode="reflect")
    taps = []
    for kh in range(KH):
        for kw in range(KW):
            taps.append(x_pad[:, :, kh:kh + stride * OH:stride,
                              kw:kw + stride * OW:stride])      # (N, Cin, OH, OW)
    # (16, N, Cin, OH, OW) -> (16, Cin, N, OH, OW) -> (K, M); K ordered (kh, kw, ci)
    patches_t = jnp.transpose(jnp.stack(taps, axis=0), (0, 2, 1, 3, 4)).reshape(K, M)

    # ---- tile sizing from a per-generation VMEM budget --------------------------
    vmem_cap = _vmem_capacity_bytes()
    vmem_limit = int(min(0.9 * vmem_cap, 100 * 1024 * 1024))
    budget = min(vmem_limit // 2, 40 * 1024 * 1024)
    w_bytes = 2 * C_sub * K * 2                                  # double-buffered weight
    per_col = max(2 * K * 2 + 2 * C_sub * 2,                     # pass-1 bytes / M column
                  2 * C_sub * 2 + 2 * C_sub * 4)                 # pass-2 bytes / M column
    tm_cols = max((budget - w_bytes) // per_col, LANE)
    TM = max(LANE, min((tm_cols // LANE) * LANE, 2048))
    TM = min(TM, _round_up(M, LANE))
    M_pad = _round_up(M, TM)
    num_tiles = M_pad // TM

    patches_t = jnp.pad(patches_t, ((0, 0), (0, M_pad - M))).astype(jnp.bfloat16)

    # (Cout, Cin, KH, KW) -> (Cout, KH, KW, Cin) -> (Cout, K) -> (C_sub, K) bf16
    w_t = jnp.transpose(weight_oihw.astype(jnp.float32), (0, 2, 3, 1)).reshape(Cout, K)
    w_t = jnp.pad(w_t, ((0, C_sub - Cout), (0, 0))).astype(jnp.bfloat16)

    # ---- pass 1: conv (bf16 intermediate) + per-tile partial stats --------------
    conv_flat, sum_parts, sumsq_parts = pl.pallas_call(
        conv_stats_kernel,
        out_shape=(
            jax.ShapeDtypeStruct((C_sub, M_pad), jnp.bfloat16),
            jax.ShapeDtypeStruct((num_tiles, C_sub, 1), jnp.float32),
            jax.ShapeDtypeStruct((num_tiles, C_sub, 1), jnp.float32),
        ),
        grid_spec=pltpu.PrefetchScalarGridSpec(
            num_scalar_prefetch=0,
            grid=(num_tiles,),
            in_specs=[
                pl.BlockSpec((K, TM), lambda i: (0, i)),
                pl.BlockSpec((C_sub, K), lambda i: (0, 0)),      # weight VMEM-resident
            ],
            out_specs=[
                pl.BlockSpec((C_sub, TM), lambda i: (0, i)),
                pl.BlockSpec((1, C_sub, 1), lambda i: (i, 0, 0)),
                pl.BlockSpec((1, C_sub, 1), lambda i: (i, 0, 0)),
            ],
        ),
        compiler_params=pltpu.CompilerParams(
            dimension_semantics=("parallel",),       # megacore-shardable on v7x
            vmem_limit_bytes=vmem_limit),
    )(patches_t, w_t)

    # ---- fold BN (training-mode batch stats) into per-channel scale/shift -------
    inv_m = 1.0 / float(M)                   # true row count (padded columns are zero)
    ch_sum = jnp.sum(sum_parts[:, :, 0], axis=0)              # (C_sub,)
    ch_sumsq = jnp.sum(sumsq_parts[:, :, 0], axis=0)          # (C_sub,)
    mean = ch_sum * inv_m
    var = jnp.maximum(ch_sumsq * inv_m - mean * mean, 0.0)
    gamma_p = jnp.pad(gamma.astype(jnp.float32), (0, C_sub - Cout))
    beta_p = jnp.pad(beta.astype(jnp.float32), (0, C_sub - Cout))
    rstd = jax.lax.rsqrt(var + BN_EPS)
    scale = (gamma_p * rstd).reshape(C_sub, 1)
    shift = (beta_p - mean * gamma_p * rstd).reshape(C_sub, 1)

    # ---- pass 2: normalize + LeakyReLU (lane-dense along M) ---------------------
    out_flat = pl.pallas_call(
        bn_lrelu_kernel,
        out_shape=jax.ShapeDtypeStruct((C_sub, M_pad), jnp.float32),
        grid_spec=pltpu.PrefetchScalarGridSpec(
            num_scalar_prefetch=0,
            grid=(num_tiles,),
            in_specs=[
                pl.BlockSpec((C_sub, TM), lambda i: (0, i)),
                pl.BlockSpec((C_sub, 1), lambda i: (0, 0)),      # scale resident
                pl.BlockSpec((C_sub, 1), lambda i: (0, 0)),      # shift resident
            ],
            out_specs=pl.BlockSpec((C_sub, TM), lambda i: (0, i)),
        ),
        compiler_params=pltpu.CompilerParams(
            dimension_semantics=("parallel",),
            vmem_limit_bytes=vmem_limit),
    )(conv_flat, scale, shift)

    # Channel-major (C, N*OH*OW) is NCHW up to a leading-axis swap (no lane moves).
    out = out_flat[:Cout, :M].reshape(Cout, N, OH, OW)
    return jnp.transpose(out, (1, 0, 2, 3))


def reference_forward(x_nchw, weight_oihw, gamma, beta, *, stride=2):
    """Pure-JAX reference. Uses bf16 conv inputs with f32 accumulation so the
    quantization matches the kernel's bf16 MXU path."""
    x = jnp.transpose(x_nchw, (0, 2, 3, 1)).astype(jnp.float32)
    x_pad = jnp.pad(x, ((0, 0), (1, 1), (1, 1), (0, 0)), mode="reflect")
    w_hwio = jnp.transpose(weight_oihw.astype(jnp.float32), (2, 3, 1, 0))
    conv = jax.lax.conv_general_dilated(
        x_pad.astype(jnp.bfloat16), w_hwio.astype(jnp.bfloat16),
        window_strides=(stride, stride), padding="VALID",
        dimension_numbers=("NHWC", "HWIO", "NHWC"),
        preferred_element_type=jnp.float32)
    mean = jnp.mean(conv, axis=(0, 1, 2), keepdims=True)
    var = jnp.mean((conv - mean) ** 2, axis=(0, 1, 2), keepdims=True)
    xhat = (conv - mean) * jax.lax.rsqrt(var + BN_EPS)
    y = xhat * gamma.reshape(1, 1, 1, -1) + beta.reshape(1, 1, 1, -1)
    y = jnp.where(y > 0, y, NEG_SLOPE * y)
    return jnp.transpose(y, (0, 3, 1, 2))


if __name__ == "__main__":
    key = jax.random.PRNGKey(0)
    k_x, k_w, k_g, k_b = jax.random.split(key, 4)

    N, Cin, H, W = 2, 4, 16, 16
    Cout = 8

    x = jax.random.normal(k_x, (N, Cin, H, W), dtype=jnp.float32)
    weight = 0.1 * jax.random.normal(k_w, (Cout, Cin, 4, 4), dtype=jnp.float32)
    gamma = 1.0 + 0.1 * jax.random.normal(k_g, (Cout,), dtype=jnp.float32)
    beta = 0.1 * jax.random.normal(k_b, (Cout,), dtype=jnp.float32)

    out = cnn_block_forward(x, weight, gamma, beta)
    out = jax.block_until_ready(out)

    ref = reference_forward(x, weight, gamma, beta)
    assert out.shape == (N, Cout, H // 2, W // 2), out.shape
    assert jnp.allclose(out, ref, atol=2e-2, rtol=2e-2), float(jnp.max(jnp.abs(out - ref)))

    print("KERNEL_OK")
</pallas_src>

<mosaic_0001>
module attributes {stable_mosaic.version = 11 : i64} {
  func.func @conv_stats_kernel(%arg0: i32, %arg1: memref<64x128xbf16, #tpu.memory_space<vmem>>, %arg2: memref<16x64xbf16, #tpu.memory_space<vmem>>, %arg3: memref<16x128xbf16, #tpu.memory_space<vmem>>, %arg4: memref<1x16x1xf32, #tpu.memory_space<vmem>>, %arg5: memref<1x16x1xf32, #tpu.memory_space<vmem>>) attributes {dimension_semantics = [#tpu.dimension_semantics<parallel>], iteration_bounds = array<i64: 1>, scalar_prefetch = 0 : i64, scratch_operands = 0 : i64, tpu.core_type = #tpu.core_type<tc>, window_params = [{transform_indices = @transform_0, window_bounds = array<i64: 64, 128>}, {pipeline_mode = #tpu.pipeline_mode<synchronous>, transform_indices = @transform_1, window_bounds = array<i64: 16, 64>}, {transform_indices = @transform_2, window_bounds = array<i64: 16, 128>}, {transform_indices = @transform_3, window_bounds = array<i64: 1, 16, 1>}, {transform_indices = @transform_4, window_bounds = array<i64: 1, 16, 1>}]} {
    %c0 = arith.constant 0 : index
    %c0_0 = arith.constant 0 : index
    %0 = vector.load %arg2[%c0, %c0_0] : memref<16x64xbf16, #tpu.memory_space<vmem>>, vector<16x64xbf16>
    %c0_1 = arith.constant 0 : index
    %c0_2 = arith.constant 0 : index
    %1 = vector.load %arg1[%c0_1, %c0_2] : memref<64x128xbf16, #tpu.memory_space<vmem>>, vector<64x128xbf16>
    %cst = arith.constant dense<0.000000e+00> : vector<16x128xf32>
    %2 = tpu.matmul %0, %1, %cst {dimension_numbers = #tpu.dot_dimension_numbers<[1], [0], [0], [1], [0, 0, 1, 1], [], []>} : vector<16x64xbf16>, vector<64x128xbf16>, vector<16x128xf32> -> vector<16x128xf32>
    %3 = arith.truncf %2 : vector<16x128xf32> to vector<16x128xbf16>
    %c0_3 = arith.constant 0 : index
    %c0_4 = arith.constant 0 : index
    %4 = vector.load %arg3[%c0_3, %c0_4] : memref<16x128xbf16, #tpu.memory_space<vmem>>, vector<16x128xbf16>
    tpu.vector_store %arg3[%c0_3, %c0_4], %3 {strides = array<i32>} : memref<16x128xbf16, #tpu.memory_space<vmem>>, vector<16x128xbf16>,
    %cst_5 = arith.constant dense<0.000000e+00> : vector<16xf32>
    %5 = vector.multi_reduction <add>, %2, %cst_5 [1] : vector<16x128xf32> to vector<16xf32>
    %6 = vector.shape_cast %5 : vector<16xf32> to vector<16x1xf32>
    %7 = vector.shape_cast %6 : vector<16x1xf32> to vector<1x16x1xf32>
    %c0_6 = arith.constant 0 : index
    %c0_7 = arith.constant 0 : index
    %c0_8 = arith.constant 0 : index
    %8 = vector.load %arg4[%c0_6, %c0_7, %c0_8] : memref<1x16x1xf32, #tpu.memory_space<vmem>>, vector<1x16x1xf32>
    tpu.vector_store %arg4[%c0_6, %c0_7, %c0_8], %7 {strides = array<i32>} : memref<1x16x1xf32, #tpu.memory_space<vmem>>, vector<1x16x1xf32>,
    %9 = arith.mulf %2, %2 : vector<16x128xf32>
    %cst_9 = arith.constant dense<0.000000e+00> : vector<16xf32>
    %10 = vector.multi_reduction <add>, %9, %cst_9 [1] : vector<16x128xf32> to vector<16xf32>
    %11 = vector.shape_cast %10 : vector<16xf32> to vector<16x1xf32>
    %12 = vector.shape_cast %11 : vector<16x1xf32> to vector<1x16x1xf32>
    %c0_10 = arith.constant 0 : index
    %c0_11 = arith.constant 0 : index
    %c0_12 = arith.constant 0 : index
    %13 = vector.load %arg5[%c0_10, %c0_11, %c0_12] : memref<1x16x1xf32, #tpu.memory_space<vmem>>, vector<1x16x1xf32>
    tpu.vector_store %arg5[%c0_10, %c0_11, %c0_12], %12 {strides = array<i32>} : memref<1x16x1xf32, #tpu.memory_space<vmem>>, vector<1x16x1xf32>,
    return
  }
  func.func @transform_0(%arg0: i32) -> (i32, i32) {
    %c0_i32 = arith.constant 0 : i32
    %c0_i32_0 = arith.constant 0 : i32
    return %c0_i32, %arg0 : i32, i32
  }
  func.func @transform_1(%arg0: i32) -> (i32, i32) {
    %c0_i32 = arith.constant 0 : i32
    %c0_i32_0 = arith.constant 0 : i32
    %c0_i32_1 = arith.constant 0 : i32
    return %c0_i32, %c0_i32_0 : i32, i32
  }
  func.func @transform_2(%arg0: i32) -> (i32, i32) {
    %c0_i32 = arith.constant 0 : i32
    %c0_i32_0 = arith.constant 0 : i32
    return %c0_i32, %arg0 : i32, i32
  }
  func.func @transform_3(%arg0: i32) -> (i32, i32, i32) {
    %c0_i32 = arith.constant 0 : i32
    %c0_i32_0 = arith.constant 0 : i32
    %c0_i32_1 = arith.constant 0 : i32
    return %arg0, %c0_i32, %c0_i32_0 : i32, i32, i32
  }
  func.func @transform_4(%arg0: i32) -> (i32, i32, i32) {
    %c0_i32 = arith.constant 0 : i32
    %c0_i32_0 = arith.constant 0 : i32
    %c0_i32_1 = arith.constant 0 : i32
    return %arg0, %c0_i32, %c0_i32_0 : i32, i32, i32
  }
}

</mosaic_0001>

<bundles_post_ra>
// kernel: tpu_custom_call.1
= control target key start
LH: loop header
LB: loop body
LE: loop exit
PB: predicated region body
PF: predicated region fallthrough
CT: control target
= control target key end

     0   :  { %10 = vsyncpa [#allocation3], 0  ;;  %s326_s0 = inlined_call_operand.hbm [shape: bf16[64,128], index: 0, kind: input, shape index: {}]   ;;  %s327_s1 = inlined_call_operand.hbm [shape: bf16[16,64], index: 1, kind: input, shape index: {}]   ;;  %s328_s2 = inlined_call_operand.hbm [shape: bf16[16,128], index: 2, kind: output, shape index: {0}]   ;;  %s329_s3 = inlined_call_operand.vmem [shape: f32[1,16,1], index: 3, kind: output, shape index: {1}]   ;;  %s330_s4 = inlined_call_operand.vmem [shape: f32[1,16,1], index: 4, kind: output, shape index: {2}]  }
   0x1   :  { %11 = vsyncpa [#allocation6], 0 }
   0x2   :  { %12 = vsyncpa [#allocation4], 0  ;;  %s17_s17 = sshll.u32 %s326_s0, 4  ;;  %s266_s18 = smov [#allocation2]   ;;  %s18_s17 = int_to_ptr.hbm [resolvable:$true] %s17_s17 }
   0x3   :  { %s19_s19 = sshll.u32 %s266_s18, 4  ;;  %s30_s22 = sshll.u32 %s327_s1, 4  ;;  %s20_s19 = int_to_ptr.vmem [resolvable:$true] %s19_s19  ;;  %s31_s22 = int_to_ptr.hbm [resolvable:$true] %s30_s22 }
   0x4   :  { %s267_s23 = smov 64   ;;  %s268_s24 = smov 4  }
   0x5   :  { %25 = dma.hbm_to_vmem [thread:$0]  %s18_s17, 512, %s20_s19, [#allocation3], %s267_s23, %s267_s23, %s268_s24  }
   0x6   :  { %s269_s25 = smov [#allocation5]  }
   0x7   :  { %s32_s26 = sshll.u32 %s269_s25, 4  ;;  %s33_s26 = int_to_ptr.vmem [resolvable:$true] %s32_s26 }
   0x8   :  { %38 = dma.hbm_to_vmem [thread:$0]  %s31_s22, 128, %s33_s26, [#allocation6], %s267_s23, %s267_s23, %s268_s24  }
   0x9   :  { %260 = dma.done.wait [#allocation3], 512  }
   0xa   :  { %261 = vsyncadd [#allocation3], 4294966784 }
   0xb   :  { %262 = dma.done.wait [#allocation6], 128  }
   0xc   :  { %263 = vsyncadd [#allocation6], 4294967168  ;;  %v177_v0 = vld [vmem:[#allocation2 + $0x18] sm:$0xff]  ;;  %v176_v1 = vld [vmem:[#allocation2 + $0x10] sm:$0xff]  ;;  %vm87_vm0 = vcmask 523264   ;;  %s270_s0 = smov [#allocation7]  }
   0xd   :  { %95 = vmatpush.bf16.msra.mxu0 %v177_v0  ;;  %v175_v2 = vld [vmem:[#allocation2 + $0x8] sm:$0xff]  ;;  %v174_v3 = vld [vmem:[#allocation2] sm:$0xff]  ;;  %s128_s1 = sshll.u32 %s270_s0, 4  ;;  %s130_s29 = sshll.u32 %s328_s2, 4  ;;  %vm113_vm1 = vcmask 7168   ;;  %s129_s1 = int_to_ptr.vmem [resolvable:$true] %s128_s1  ;;  %s131_s29 = int_to_ptr.hbm [resolvable:$true] %s130_s29 }
   0xe   :  { %v173_v4 = vld [vmem:[#allocation5] sm:$0xff] }
  0x11   :  { %96 = vmatpush.bf16.msra.mxu0 %v176_v1 }
  0x15   :  { %97 = vmatpush.bf16.msra.mxu0 %v175_v2 }
  0x19   :  { %98 = vmatpush.bf16.msra.mxu0 %v174_v3 }
  0x1c   :  { %172 = vmatmul.msk.bf16.vlgmr.msra.gmra.mxu0 %vm87_vm0, %v173_v4 }
  0x99   :  { %v100_v5 = vpop.f32.mrf.mxu0 }
  0x9a   :  { %109 = vadd.xlane.f32.xlu0 %v100_v5  ;;  %v116_v6 = vmul.f32 %v100_v5, %v100_v5 }
  0x9c   :  { %118 = vadd.xlane.f32.xlu1 %v116_v6 }
  0xa1   :  { %v102_v7 = vpop.f32.mrf.mxu0 }
  0xa2   :  { %v181_v8 = vpack.c.bf16 %v102_v7, %v100_v5  ;;  %111 = vadd.xlane.f32.xlu0 %v102_v7  ;;  %v117_v9 = vmul.f32 %v102_v7, %v102_v7 }
  0xa4   :  { %182 = vst [vmem:[#allocation7] sm:$0xff] %v181_v8   ;;  %120 = vadd.xlane.f32.xlu1 %v117_v9 }
  0xa5   :  { %136 = dma.vmem_to_hbm [thread:$0]  %s129_s1, 128, %s131_s29, [#allocation4], %s267_s23, %s267_s23, %s268_s24  }
 0x10d   :  { %v110_v10 = vpop.xlane.xlu0 %109 }
 0x10e   :  { %114 = vst.msk [vmem:[%s329_s3] sm:$0xff] %vm113_vm1, %v110_v10 }
 0x10f   :  { %v119_v11 = vpop.xlane.xlu1 %118 }
 0x110   :  { %122 = vst.msk [vmem:[%s330_s4] sm:$0xff] %vm113_vm1, %v119_v11 }
 0x115   :  { %v112_v12 = vpop.xlane.xlu0 %111 }
 0x116   :  { %115 = vst.msk [vmem:[%s329_s3 + $0x8] sm:$0xff] %vm113_vm1, %v112_v12 }
 0x117   :  { %v121_v13 = vpop.xlane.xlu1 %120 }
 0x118   :  { %123 = vst.msk [vmem:[%s330_s4 + $0x8] sm:$0xff] %vm113_vm1, %v121_v13 }
 0x119   :  { %264 = dma.done.wait [#allocation4], 128  }
 0x11a   :  { %265 = vsyncadd [#allocation4], 4294967168 }
 0x11b   :  { %149 = vsyncpa [#allocation3], 1 }
 0x11c   :  { %150 = vsyncpa [#allocation6], 1 }
 0x11d   :  { %151 = vsyncpa [#allocation4], 1 }

</bundles_post_ra>
